<compile_context>
chip_gen: v6e
topology: v6e:2x2x1
jax: 0.10.0
libtpu: 0.0.40
codegen_flags: <defaults>
</compile_context>

<pallas_src>
import functools

import numpy as np
import jax
import jax.numpy as jnp
from jax import lax
from jax.experimental import pallas as pl
from jax.experimental.pallas import tpu as pltpu

NEG = -1.0e30                      # finite "-inf" used for masking in-kernel


def _round_up(x, m):
    return ((x + m - 1) // m) * m


def _device_caps():
    """(vmem_capacity_bytes, mxu_rows) with conservative fallbacks."""
    vmem_cap = 64 * 1024 * 1024        # v7x per-core capacity (smallest target)
    mxu_rows = 128                     # safe everywhere (v5e MXU is 128x128)
    try:
        info = pltpu.get_tpu_info()
        cap = getattr(info, "vmem_capacity_bytes", None)
        if cap:
            vmem_cap = int(cap)
    except Exception:
        pass
    try:
        kind = jax.devices()[0].device_kind.lower()
        if "v6" in kind or "v7" in kind:
            mxu_rows = 256             # 2x256 MXUs on v6e/v7x
    except Exception:
        pass
    return vmem_cap, mxu_rows


# --------------------------- phase 1: log-probs ---------------------------
def _rnnt_logprob_kernel(acts_ref, labels_ref,            # VMEM inputs
                         blank_out_ref, label_out_ref,    # VMEM outputs
                         *, blank, out_U):
    acts = acts_ref[0].astype(jnp.float32)                # (tT, U, D)
    tT, U, D = acts.shape

    # log-softmax denominator only; never materialize the full logp tensor.
    m = jnp.max(acts, axis=-1, keepdims=True)
    lse = jnp.log(jnp.sum(jnp.exp(acts - m), axis=-1, keepdims=True)) + m   # (tT,U,1)

    # blank log-prob: static lane slice (blank is a compile-time constant).
    lp_blank = (acts[:, :, blank:blank + 1] - lse)[:, :, 0]                 # (tT,U)

    # label log-prob: where-select gather along D (no f32 one-hot temporary).
    lab = labels_ref[0]                                                     # (1,U,1) i32
    d_iota = lax.broadcasted_iota(jnp.int32, (1, U, D), 2)
    lp_label = jnp.sum(jnp.where(d_iota == lab, acts, 0.0), axis=-1) - lse[:, :, 0]

    # Positions u >= U_b - 1 / lane pads are never read by the DP at valid
    # positions, so no label-length masking is needed here; pads just need to
    # be finite (zero-filled) so the phase-2 cumsum matmul stays NaN-free.
    if out_U == U:
        blank_out_ref[...] = lp_blank.reshape(1, tT, U)
        label_out_ref[...] = lp_label.reshape(1, tT, U)
    else:
        blank_out_ref[...] = jnp.zeros(blank_out_ref.shape, jnp.float32)
        label_out_ref[...] = jnp.zeros(label_out_ref.shape, jnp.float32)
        blank_out_ref[:, :, :U] = lp_blank.reshape(1, tT, U)
        label_out_ref[:, :, :U] = lp_label.reshape(1, tT, U)


# --------------------------- phase 2: batched alpha DP ---------------------------
def _rnnt_dp_kernel(tile_maxT_ref,                         # SMEM scalar prefetch (nBt,)
                    act_lens_ref, label_lens_ref,          # VMEM (Bblk,1) i32
                    lp_blank_ref, lp_label_ref,            # VMEM (T, Bblk, Up) f32
                    out_ref,                               # VMEM (Bblk, 128) f32
                    *, fastemit_lambda):
    T, Bblk, Up = lp_blank_ref.shape
    t_max = tile_maxT_ref[pl.program_id(0)]                # max T_b in this B-tile

    Tb = act_lens_ref[...]                                 # (Bblk, 1) i32
    Ub = label_lens_ref[...] + 1                           # (Bblk, 1) i32

    # ---- hoisted loop invariants ----
    u_iota = lax.broadcasted_iota(jnp.int32, (Bblk, Up), 1)
    valid_u = u_iota < Ub                                  # (Bblk, Up)
    neg_row = jnp.full((Bblk, Up), NEG, jnp.float32)
    a_first = jnp.where(u_iota == 0, 0.0, NEG).astype(jnp.float32)

    r_i = lax.broadcasted_iota(jnp.int32, (Up, Up), 0)
    c_i = lax.broadcasted_iota(jnp.int32, (Up, Up), 1)
    excl_tri = (r_i < c_i).astype(jnp.float32)             # exclusive cumsum
    incl_tri = (r_i <= c_i).astype(jnp.float32)            # inclusive cumsum

    def alpha_row(a_row, s_row):
        # alpha[t,u] = S[u] + logsumexp_{k<=u}(a_row[k] - S[k]); lane-vectorized.
        # TODO(synk): single row-wide max stabilization; for extreme per-row
        # dynamic range (very long T) a chunked/per-prefix max would be tighter.
        z = jnp.where(valid_u, jnp.maximum(a_row - s_row, NEG), neg_row)
        mrow = jnp.max(z, axis=-1, keepdims=True)          # (Bblk, 1)
        v = jnp.exp(z - mrow)
        csum = jnp.dot(v, incl_tri, preferred_element_type=jnp.float32)
        return s_row + mrow + jnp.log(jnp.maximum(csum, 1e-37))

    # ---- peeled t == 0 iteration (removes the per-step t==0 select) ----
    blank0 = lp_blank_ref[0]                               # (Bblk, Up)
    s0 = jnp.dot(lp_label_ref[0], excl_tri, preferred_element_type=jnp.float32)
    x0 = alpha_row(a_first, s0)
    ll0 = jnp.where(Tb == 1, x0 + blank0, jnp.zeros((Bblk, Up), jnp.float32))

    def body(t, carry):
        x_prev, blank_prev, ll_cap = carry
        blank_cur = lp_blank_ref[t]                        # (Bblk, Up)
        s_row = jnp.dot(lp_label_ref[t], excl_tri,
                        preferred_element_type=jnp.float32)
        x = alpha_row(x_prev + blank_prev, s_row)
        ll_cap = jnp.where(t == (Tb - 1), x + blank_cur, ll_cap)
        return x, blank_cur, ll_cap

    _, _, ll_cap = lax.fori_loop(1, t_max, body, (x0, blank0, ll0))

    # ll = alpha[T_b-1, U_b-1] + lp_blank[T_b-1, U_b-1]
    ll = jnp.sum(jnp.where(u_iota == (Ub - 1), ll_cap, 0.0),
                 axis=-1, keepdims=True)                   # (Bblk, 1)
    cost = -(1.0 + fastemit_lambda) * ll
    out_ref[...] = jnp.broadcast_to(cost, out_ref.shape).astype(out_ref.dtype)


# --------------------------- wrapper ---------------------------
def rnnt_loss(acts, labels, act_lens, label_lens,
              blank=0, fastemit_lambda=0.001, reduction='mean'):
    """acts [B,T,U,D] f32, labels [B,U-1] i32, act_lens/label_lens [B] i32."""
    acts = jnp.asarray(acts, jnp.float32)
    labels = jnp.asarray(labels, jnp.int32)
    act_lens = jnp.asarray(act_lens, jnp.int32)
    label_lens = jnp.asarray(label_lens, jnp.int32)

    B, T, U, D = acts.shape

    vmem_cap, mxu_rows = _device_caps()
    vmem_limit = int(min(vmem_cap, max(vmem_cap * 3 // 4, 32 * 1024 * 1024)))

    Up = _round_up(U, 128)       # lane-dense width for lp arrays and the DP

    # ---------------- phase-2 batch tiling ----------------
    if B <= 8:
        B_pad, Bblk = B, B
    else:
        B_pad = _round_up(B, 8)
        per_ex = 2 * 2 * T * Up * 4          # two (T,*,Up) arrays, double-buffered
        fixed = 8 * Up * Up + (4 << 20)      # tri matrices + headroom
        cap = min(mxu_rows, max(8, (vmem_limit - fixed) // per_ex))
        Bblk = 8
        d = 16
        while d <= B_pad:                    # largest mult-of-8 divisor of B_pad <= cap
            if B_pad % d == 0 and d <= cap:
                Bblk = d
            d += 8
    nBt = B_pad // Bblk
    # TODO(synk): on 2-TensorCore chips (v7x) prefer nBt >= 2 so the parallel grid
    # axis shards B-tiles across cores (needs a reliable core-count query).
    # TODO(synk): sorting examples by act_lens before tiling tightens tile_maxT
    # whenever nBt > 1.

    # ---------------- phase 1: log-softmax + blank/label gather ----------------
    labels_p = jnp.zeros((B, U), jnp.int32).at[:, :labels.shape[1]].set(labels)
    labels4d = labels_p.reshape(B, 1, U, 1)

    blk_budget = max(4 << 20, min(16 << 20, vmem_limit // 6))
    rows = max(8, ((blk_budget // (U * D * 4)) // 8) * 8)
    tT = T if T <= rows else rows            # tT mult of 8, or full T (constraint-safe)
    nT1 = pl.cdiv(T, tT)

    lp_blank, lp_label = pl.pallas_call(
        functools.partial(_rnnt_logprob_kernel, blank=int(blank), out_U=Up),
        out_shape=(jax.ShapeDtypeStruct((B, T, Up), jnp.float32),
                   jax.ShapeDtypeStruct((B, T, Up), jnp.float32)),
        grid=(B, nT1),
        in_specs=[
            pl.BlockSpec((1, tT, U, D), lambda b, ti: (b, ti, 0, 0)),
            pl.BlockSpec((1, 1, U, 1), lambda b, ti: (b, 0, 0, 0)),
        ],
        out_specs=(
            pl.BlockSpec((1, tT, Up), lambda b, ti: (b, ti, 0)),
            pl.BlockSpec((1, tT, Up), lambda b, ti: (b, ti, 0)),
        ),
        compiler_params=pltpu.CompilerParams(
            dimension_semantics=("parallel", "parallel"),
            vmem_limit_bytes=vmem_limit),
    )(acts, labels4d)

    # ---- relayout (B,T,Up) -> (T,B_pad,Up) so the serial DP slices the leading dim
    # TODO(synk): fold this transpose into phase 1 (emit (T,B,Up) blocks directly)
    # to save one HBM pass over the lp arrays.
    def to_tbu(x):
        if B_pad != B:
            x = jnp.pad(x, ((0, B_pad - B), (0, 0), (0, 0)))
        return jnp.transpose(x, (1, 0, 2))

    lp_blank_t = to_tbu(lp_blank)
    lp_label_t = to_tbu(lp_label)

    def pad_b(x, fill):
        if B_pad == B:
            return x
        return jnp.pad(x, ((0, B_pad - B),), constant_values=fill)

    act_lens_p = pad_b(act_lens, 1).reshape(B_pad, 1)
    label_lens_p = pad_b(label_lens, 0).reshape(B_pad, 1)
    tile_maxT = jnp.max(act_lens_p.reshape(nBt, Bblk), axis=1).astype(jnp.int32)

    # ---------------- phase 2: alpha DP, batched over large B-tiles ----------------
    out = pl.pallas_call(
        functools.partial(_rnnt_dp_kernel, fastemit_lambda=float(fastemit_lambda)),
        out_shape=jax.ShapeDtypeStruct((B_pad, 128), jnp.float32),
        grid_spec=pltpu.PrefetchScalarGridSpec(
            num_scalar_prefetch=1,
            grid=(nBt,),
            in_specs=[
                pl.BlockSpec((Bblk, 1), lambda i, mt: (i, 0)),
                pl.BlockSpec((Bblk, 1), lambda i, mt: (i, 0)),
                pl.BlockSpec((T, Bblk, Up), lambda i, mt: (0, i, 0)),
                pl.BlockSpec((T, Bblk, Up), lambda i, mt: (0, i, 0)),
            ],
            out_specs=pl.BlockSpec((Bblk, 128), lambda i, mt: (i, 0)),
        ),
        compiler_params=pltpu.CompilerParams(
            dimension_semantics=("parallel",),
            vmem_limit_bytes=vmem_limit),
    )(tile_maxT, act_lens_p, label_lens_p, lp_blank_t, lp_label_t)

    costs = out[:B, 0]                                   # per-example cost, (B,)
    # TODO(synk): act_lens == 0 silently yields cost 0 for that example.
    if reduction in ('sum', 'mean'):
        costs = jnp.sum(costs).reshape(1)
        if reduction == 'mean':
            costs = costs / B
    return costs


class RNNTLoss:
    def __init__(self, blank=0, fastemit_lambda=0.001, reduction='mean'):
        self.blank = blank
        self.fastemit_lambda = fastemit_lambda
        self.reduction = reduction

    def __call__(self, acts, labels, act_lens, label_lens):
        return rnnt_loss(acts, labels, act_lens, label_lens,
                         blank=self.blank,
                         fastemit_lambda=self.fastemit_lambda,
                         reduction=self.reduction)


# -------------------- pure NumPy reference (for self-check) --------------------
def rnnt_ref_numpy(acts, labels, act_lens, label_lens, blank, fe_lambda, reduction):
    acts = np.asarray(acts, dtype=np.float64)
    labels = np.asarray(labels)
    B, T, U, D = acts.shape
    mx = acts.max(axis=-1, keepdims=True)
    logp = acts - (np.log(np.exp(acts - mx).sum(-1, keepdims=True)) + mx)
    costs = np.zeros((B,), np.float64)
    for b in range(B):
        Tb = int(act_lens[b]); Ub = int(label_lens[b]) + 1
        alphas = np.full((Tb, Ub), -np.inf)
        alphas[0, 0] = 0.0
        for t in range(Tb):
            for u in range(Ub):
                if t == 0 and u == 0:
                    continue
                terms = []
                if t > 0:
                    terms.append(alphas[t - 1, u] + logp[b, t - 1, u, blank])
                if u > 0:
                    terms.append(alphas[t, u - 1] + logp[b, t, u - 1, int(labels[b, u - 1])])
                alphas[t, u] = np.logaddexp.reduce(np.array(terms))
        ll = alphas[Tb - 1, Ub - 1] + logp[b, Tb - 1, Ub - 1, blank]
        costs[b] = -(1.0 + fe_lambda) * ll
    if reduction in ('sum', 'mean'):
        out = np.array([costs.sum()])
        if reduction == 'mean':
            out = out / B
        return out
    return costs


if __name__ == "__main__":
    key = jax.random.PRNGKey(0)
    B, T, U, D = 2, 8, 5, 16          # U = max_label_len + 1

    k_acts, k_lab = jax.random.split(key)
    acts = jax.random.normal(k_acts, (B, T, U, D), dtype=jnp.float32)
    labels = jax.random.randint(k_lab, (B, U - 1), 1, D, dtype=jnp.int32)
    act_lens = jnp.array([8, 6], dtype=jnp.int32)     # max == T
    label_lens = jnp.array([4, 3], dtype=jnp.int32)   # max == U - 1

    loss_mod = RNNTLoss(blank=0, fastemit_lambda=0.001, reduction='mean')
    out = loss_mod(acts, labels, act_lens, label_lens)
    out = jax.block_until_ready(out)

    ref = rnnt_ref_numpy(np.asarray(acts), np.asarray(labels),
                         np.asarray(act_lens), np.asarray(label_lens),
                         blank=0, fe_lambda=0.001, reduction='mean')

    assert out.shape == (1,)
    np.testing.assert_allclose(np.asarray(out, np.float64), ref, rtol=1e-4, atol=1e-4)
    print("KERNEL_OK")
</pallas_src>

<mosaic_0001>
module attributes {stable_mosaic.version = 11 : i64} {
  func.func @_rnnt_logprob_kernel(%arg0: i32, %arg1: i32, %arg2: memref<1x8x5x16xf32, #tpu.memory_space<vmem>>, %arg3: memref<1x1x5x1xi32, #tpu.memory_space<vmem>>, %arg4: memref<1x8x128xf32, #tpu.memory_space<vmem>>, %arg5: memref<1x8x128xf32, #tpu.memory_space<vmem>>) attributes {dimension_semantics = [#tpu.dimension_semantics<parallel>, #tpu.dimension_semantics<parallel>], iteration_bounds = array<i64: 2, 1>, scalar_prefetch = 0 : i64, scratch_operands = 0 : i64, tpu.core_type = #tpu.core_type<tc>, window_params = [{transform_indices = @transform_0, window_bounds = array<i64: 1, 8, 5, 16>}, {transform_indices = @transform_1, window_bounds = array<i64: 1, 1, 5, 1>}, {transform_indices = @transform_2, window_bounds = array<i64: 1, 8, 128>}, {transform_indices = @transform_3, window_bounds = array<i64: 1, 8, 128>}]} {
    %c0 = arith.constant 0 : index
    %c0_0 = arith.constant 0 : index
    %c0_1 = arith.constant 0 : index
    %c0_2 = arith.constant 0 : index
    %0 = vector.load %arg2[%c0, %c0_0, %c0_1, %c0_2] : memref<1x8x5x16xf32, #tpu.memory_space<vmem>>, vector<1x8x5x16xf32>
    %1 = vector.shape_cast %0 : vector<1x8x5x16xf32> to vector<8x5x16xf32>
    %cst = arith.constant dense<0xFF800000> : vector<8x5xf32>
    %2 = vector.multi_reduction <maximumf>, %1, %cst [2] : vector<8x5x16xf32> to vector<8x5xf32>
    %3 = vector.shape_cast %2 : vector<8x5xf32> to vector<8x5x1xf32>
    %4 = vector.broadcast %3 : vector<8x5x1xf32> to vector<8x5x16xf32>
    %5 = arith.subf %1, %4 : vector<8x5x16xf32>
    %6 = math.exp %5 : vector<8x5x16xf32>
    %cst_3 = arith.constant dense<0.000000e+00> : vector<8x5xf32>
    %7 = vector.multi_reduction <add>, %6, %cst_3 [2] : vector<8x5x16xf32> to vector<8x5xf32>
    %8 = vector.shape_cast %7 : vector<8x5xf32> to vector<8x5x1xf32>
    %9 = math.log %8 : vector<8x5x1xf32>
    %10 = arith.addf %9, %3 : vector<8x5x1xf32>
    %11 = vector.extract_strided_slice %1 {offsets = [0, 0, 0], sizes = [8, 5, 1], strides = [1, 1, 1]} : vector<8x5x16xf32> to vector<8x5x1xf32>
    %12 = arith.subf %11, %10 : vector<8x5x1xf32>
    %13 = vector.shape_cast %12 : vector<8x5x1xf32> to vector<8x5xf32>
    %c0_4 = arith.constant 0 : index
    %c0_5 = arith.constant 0 : index
    %c0_6 = arith.constant 0 : index
    %c0_7 = arith.constant 0 : index
    %14 = vector.load %arg3[%c0_4, %c0_5, %c0_6, %c0_7] : memref<1x1x5x1xi32, #tpu.memory_space<vmem>>, vector<1x1x5x1xi32>
    %15 = vector.shape_cast %14 : vector<1x1x5x1xi32> to vector<1x5x1xi32>
    %16 = tpu.iota {dimensions = array<i32: 2>} : vector<1x5x16xi32>
    %17 = vector.broadcast %15 : vector<1x5x1xi32> to vector<1x5x16xi32>
    %18 = arith.cmpi eq, %16, %17 : vector<1x5x16xi32>
    %cst_8 = arith.constant 0.000000e+00 : f32
    %19 = vector.shape_cast %18 : vector<1x5x16xi1> to vector<1x5x16xi1>
    %20 = vector.broadcast %19 : vector<1x5x16xi1> to vector<8x5x16xi1>
    %21 = vector.broadcast %cst_8 : f32 to vector<8x5x16xf32>
    %22 = arith.select %20, %1, %21 : vector<8x5x16xi1>, vector<8x5x16xf32>
    %cst_9 = arith.constant dense<0.000000e+00> : vector<8x5xf32>
    %23 = vector.multi_reduction <add>, %22, %cst_9 [2] : vector<8x5x16xf32> to vector<8x5xf32>
    %24 = vector.shape_cast %10 : vector<8x5x1xf32> to vector<8x5xf32>
    %25 = arith.subf %23, %24 : vector<8x5xf32>
    %cst_10 = arith.constant 0.000000e+00 : f32
    %26 = vector.broadcast %cst_10 : f32 to vector<1x8x128xf32>
    %c0_11 = arith.constant 0 : index
    %c0_12 = arith.constant 0 : index
    %c0_13 = arith.constant 0 : index
    %27 = vector.load %arg4[%c0_11, %c0_12, %c0_13] : memref<1x8x128xf32, #tpu.memory_space<vmem>>, vector<1x8x128xf32>
    tpu.vector_store %arg4[%c0_11, %c0_12, %c0_13], %26 {strides = array<i32>} : memref<1x8x128xf32, #tpu.memory_space<vmem>>, vector<1x8x128xf32>,
    %cst_14 = arith.constant 0.000000e+00 : f32
    %28 = vector.broadcast %cst_14 : f32 to vector<1x8x128xf32>
    %c0_15 = arith.constant 0 : index
    %c0_16 = arith.constant 0 : index
    %c0_17 = arith.constant 0 : index
    %29 = vector.load %arg5[%c0_15, %c0_16, %c0_17] : memref<1x8x128xf32, #tpu.memory_space<vmem>>, vector<1x8x128xf32>
    tpu.vector_store %arg5[%c0_15, %c0_16, %c0_17], %28 {strides = array<i32>} : memref<1x8x128xf32, #tpu.memory_space<vmem>>, vector<1x8x128xf32>,
    %30 = vector.shape_cast %13 : vector<8x5xf32> to vector<1x8x5xf32>
    %c0_18 = arith.constant 0 : index
    %c0_19 = arith.constant 0 : index
    %c0_20 = arith.constant 0 : index
    %31 = vector.load %arg4[%c0_18, %c0_19, %c0_20] : memref<1x8x128xf32, #tpu.memory_space<vmem>>, vector<1x8x5xf32>
    tpu.vector_store %arg4[%c0_18, %c0_19, %c0_20], %30 {strides = array<i32>} : memref<1x8x128xf32, #tpu.memory_space<vmem>>, vector<1x8x5xf32>,
    %32 = vector.shape_cast %25 : vector<8x5xf32> to vector<1x8x5xf32>
    %c0_21 = arith.constant 0 : index
    %c0_22 = arith.constant 0 : index
    %c0_23 = arith.constant 0 : index
    %33 = vector.load %arg5[%c0_21, %c0_22, %c0_23] : memref<1x8x128xf32, #tpu.memory_space<vmem>>, vector<1x8x5xf32>
    tpu.vector_store %arg5[%c0_21, %c0_22, %c0_23], %32 {strides = array<i32>} : memref<1x8x128xf32, #tpu.memory_space<vmem>>, vector<1x8x5xf32>,
    return
  }
  func.func @transform_0(%arg0: i32, %arg1: i32) -> (i32, i32, i32, i32) {
    %c0_i32 = arith.constant 0 : i32
    %c0_i32_0 = arith.constant 0 : i32
    %c0_i32_1 = arith.constant 0 : i32
    return %arg0, %arg1, %c0_i32, %c0_i32_0 : i32, i32, i32, i32
  }
  func.func @transform_1(%arg0: i32, %arg1: i32) -> (i32, i32, i32, i32) {
    %c0_i32 = arith.constant 0 : i32
    %c0_i32_0 = arith.constant 0 : i32
    %c0_i32_1 = arith.constant 0 : i32
    %c0_i32_2 = arith.constant 0 : i32
    return %arg0, %c0_i32, %c0_i32_0, %c0_i32_1 : i32, i32, i32, i32
  }
  func.func @transform_2(%arg0: i32, %arg1: i32) -> (i32, i32, i32) {
    %c0_i32 = arith.constant 0 : i32
    %c0_i32_0 = arith.constant 0 : i32
    return %arg0, %arg1, %c0_i32 : i32, i32, i32
  }
  func.func @transform_3(%arg0: i32, %arg1: i32) -> (i32, i32, i32) {
    %c0_i32 = arith.constant 0 : i32
    %c0_i32_0 = arith.constant 0 : i32
    return %arg0, %arg1, %c0_i32 : i32, i32, i32
  }
}

</mosaic_0001>

<bundles_post_ra>
// kernel: tpu_custom_call.1
= control target key start
LH: loop header
LB: loop body
LE: loop exit
PB: predicated region body
PF: predicated region fallthrough
CT: control target
= control target key end

     0   :  { %9 = vsyncpa [#allocation3], 0  ;;  %s1259_s0 = inlined_call_operand.vmem [shape: f32[2,8,5,16], index: 0, kind: input, shape index: {}]   ;;  %s1260_s1 = inlined_call_operand.vmem [shape: s32[2,1,5,1], index: 1, kind: input, shape index: {}]   ;;  %s1261_s2 = inlined_call_operand.hbm [shape: f32[2,8,128], index: 2, kind: output, shape index: {0}]   ;;  %s1262_s3 = inlined_call_operand.hbm [shape: f32[2,8,128], index: 3, kind: output, shape index: {1}]  }
   0x1   :  { %11 = vsyncpa [#allocation3 + $0x1], 0 }
   0x2   :  { %12 = vsyncpa [#allocation5], 0 }
   0x3   :  { %14 = vsyncpa [#allocation5 + $0x1], 0  ;;  %s921_s12 = smov 0   ;;  %s923_s13 = smov 0  }
   0x4   :  { %s925_s14 = smov 0   ;;  %s927_s15 = smov 0  }
   0x5   :  { %s929_s16 = smov 0   ;;  %s931_s17 = smov 0  }
   0x6 LB: > { %s676_s18 = sadd.s32 4294967295, %s895_s17   ;;  %s677_s19 = sadd.s32 4294967294, %s895_s17   ;;  %s895_s17 = sphi %s931_s17, %s20_s17   ;;  %s891_s16 = sphi %s929_s16, %s1271_s16   ;;  %s887_s15 = sphi %s927_s15, %s1270_s15   ;;  %s883_s14 = sphi %s925_s14, %s1269_s14   ;;  %s879_s13 = sphi %s923_s13, %s1268_s13   ;;  %s875_s12 = sphi %s921_s12, %s1267_s12  }
   0x7   : > { %s32_s20 = sadd.s32 1, %s891_s16  ;;  %s95_s21 = sadd.s32 1, %s883_s14 }
   0x8   : > { %p34_p0 = scmp.ge.s32.totalorder %s32_s20, 2  ;;  %p105_p1 = scmp.ne.s32.totalorder %s883_s14, %s879_s13 }
   0x9   : > { %p106_p2 = scmp.eq.s32.totalorder %s676_s18, 1  ;;  %p111_p3 = scmp.ne.s32.totalorder %s879_s13, %s875_s12 }
   0xa   : > { %s1273_s20 = smov (%p34_p0, %s32_s20), 0  ;;  %p112_p5 = scmp.eq.s32.totalorder %s677_s19, 1 }
   0xb   : > { %p961_p4 = por %p106_p2, %p105_p1  ;;  %s90_s23 = ssub.s32 %s891_s16, %s1273_s20 }
   0xc   : > { %p680_p6 = scmp.ge.s32.totalorder %s895_s17, 1  ;;  %p93_p7 = scmp.eq.s32.totalorder %s90_s23, 0 }
   0xd   : > { %p968_p8 = por %p112_p5, %p111_p3  ;;  %p178_p9 = scmp.lt.s32.totalorder %s895_s17, 3 }
   0xe   : > { %s974_s25 = scalar_select %p93_p7, %s883_s14, %s95_s21  }
   0xf   : > { %p179_p10 = pnand %p680_p6, %p178_p9 }
  0x10   : > { %p216_p11 = scmp.lt.s32.totalorder (!%p179_p10), %s887_s15, 1  ;;  %s1124_s8 = sand.u32 (!%p179_p10), 1, %s879_s13  }
  0x11   : > { %182 = sbr.rel (%p179_p10) target bundleno = 555 (0x22b), region = 28  ;;  %s681_s9 = sshll.u32 (!%p179_p10), %s1124_s8, 3 }
  0x12   : > { %s1129_s10 = scalar_lea.vmem (!%p179_p10), [#allocation4], %s681_s9  ;;  %s1135_s11 = scalar_lea.vmem (!%p179_p10), [#allocation2], %s681_s9 }
  0x13   : > { %s688_s18 = sshll.u32 (!%p179_p10), %s887_s15, 7  ;;  %s557_s19 = sshll.u32 (!%p179_p10), %s1129_s10, 4  ;;  %s1169_s19 = int_to_ptr.vmem [resolvable:$true] %s557_s19 }
  0x14   : > { %s789_s28 = scalar_lea.vmem (!%p179_p10), %s1169_s19, 128  ;;  %s899_s29 = smov (!%p179_p10), [#allocation4]  }
  0x15   : > { %p790_p12 = scmp.ne.s32.totalorder (!%p179_p10), %s1169_s19, %s789_s28 }
  0x16   : > { %s978_s26 = scalar_select %p216_p11, %s887_s15, 1  ;;  %vm237_vm0 = vcmask 126976   ;;  %v897_v16 = vmov 0   ;;  %v343_v63 = vlaneseq  ;;  %vm457_vm2 = vcmask 1041409  }
  0x17   : > { %755 = vset.pattern.permute.xlu0 %v897_v16  ;;  %756 = vset.pattern.permute.xlu1 %v897_v16  ;;  %vm459_vm3 = vcmask 1042434   ;;  %vm461_vm4 = vcmask 1043459   ;;  %vm463_vm5 = vcmask 1044484   ;;  %vm465_vm6 = vcmask 1045509   ;;  %p791_p13 = pnand %p790_p12, %p961_p4 }
  0x18   : > { %s692_s27 = sshll.u32 %s978_s26, 6  ;;  %s685_s4 = sshll.u32 %s978_s26, 3  ;;  %vm467_vm7 = vcmask 1046534   ;;  %vm469_vm8 = vcmask 1047559   ;;  %vm472_vm9 = vcmask 39936  }
  0x19   : > { %s223_s30 = scalar_lea.vmem %s1259_s0, %s692_s27  ;;  %s228_s7 = scalar_lea.vmem %s1260_s1, %s685_s4 }
  0x1a   : > { %v984_v0 = vld [vmem:[%s223_s30] sm:$0x1f]  ;;  %v986_v1 = vld [vmem:[%s223_s30 + $0x10] sm:$0x1f]  ;;  %v988_v2 = vld [vmem:[%s223_s30 + $0x8] sm:$0x1f]  ;;  %s1167_s26 = scalar_lea.hbm %s1262_s3, %s688_s18  ;;  %p792_p0 = pneg %p791_p13 }
  0x1b   : > { %v238_v3 = vsel %vm237_vm0, %v984_v0, -inf  ;;  %v244_v4 = vsel %vm237_vm0, %v986_v1, -inf  ;;  %v994_v5 = vld [vmem:[%s223_s30 + $0x18] sm:$0x1f]  ;;  %v241_v6 = vsel %vm237_vm0, %v988_v2, -inf  ;;  %s529_s27 = scalar_lea.sflag [#allocation5], %s1124_s8 }
  0x1c   : > { %239 = vmax.xlane.f32.xlu0 %v238_v3  ;;  %245 = vmax.xlane.f32.xlu1 %v244_v4  ;;  %v247_v7 = vsel %vm237_vm0, %v994_v5, -inf  ;;  %v1000_v8 = vld [vmem:[%s223_s30 + $0x20] sm:$0x1f]  ;;  %v1002_v9 = vld [vmem:[%s223_s30 + $0x28] sm:$0x1f]  ;;  %v1061_v3 = vand.u32 127, %v343_v63 }
  0x1d   : > { %v250_v10 = vsel %vm237_vm0, %v1000_v8, -inf  ;;  %v253_v11 = vsel %vm237_vm0, %v1002_v9, -inf  ;;  %v1008_v12 = vld [vmem:[%s223_s30 + $0x30] sm:$0x1f]  ;;  %v1010_v13 = vld [vmem:[%s223_s30 + $0x38] sm:$0x1f] }
  0x1e   : > { %v256_v14 = vsel %vm237_vm0, %v1008_v12, -inf  ;;  %v259_v15 = vsel %vm237_vm0, %v1010_v13, -inf  ;;  %v342_v57 = vld [vmem:[%s228_s7] sm:$0x1f]  ;;  %s793_s30 = sshll.u32 %s899_s29, 4  ;;  %s794_s30 = int_to_ptr.vmem [resolvable:$false] %s793_s30 }
  0x1f   : > { %s795_s4 = scalar_lea.vmem %s794_s30, 256  ;;  %p796_p1 = scmp.lt.s32.totalorder %s1169_s19, %s794_s30 }
  0x20   : > { %242 = vmax.xlane.f32.xlu0 %v241_v6  ;;  %248 = vmax.xlane.f32.xlu1 %v247_v7  ;;  %p797_p2 = scmp.lt.s32.totalorder %s795_s4, %s789_s28 }
  0x22   : > { %p798_p3 = por %p797_p2, %p796_p1 }
  0x24   : > { %251 = vmax.xlane.f32.xlu0 %v250_v10  ;;  %254 = vmax.xlane.f32.xlu1 %v253_v11  ;;  %p799_p5 = pnand %p798_p3, %p792_p0 }
  0x28   : > { %257 = vmax.xlane.f32.xlu0 %v256_v14  ;;  %260 = vmax.xlane.f32.xlu1 %v259_v15 }
  0xa5   : > { %v1016_v17 = vpop.xlane.xlu0 %239  ;;  %v1018_v18 = vpop.xlane.xlu1 %245 }
  0xa6   : > { %v262_v19 = vsub.f32 %v984_v0, %v1016_v17  ;;  %v264_v20 = vsub.f32 %v986_v1, %v1018_v18 }
  0xa8   : > { %v270_v21 = vmul.f32 1.442695, %v262_v19  ;;  %v274_v22 = vmul.f32 1.442695, %v264_v20 }
  0xa9   : > { %v1024_v23 = vpop.xlane.xlu0 %242  ;;  %v1026_v24 = vpop.xlane.xlu1 %248 }
  0xaa   : > { %757 = vpow2.f32 %v270_v21  ;;  %v263_v25 = vsub.f32 %v988_v2, %v1024_v23  ;;  %v265_v26 = vsub.f32 %v994_v5, %v1026_v24 }
  0xab   : > { %759 = vpow2.f32 %v274_v22 }
  0xac   : > { %v272_v27 = vmul.f32 1.442695, %v263_v25  ;;  %v276_v28 = vmul.f32 1.442695, %v265_v26 }
  0xad   : > { %v1032_v29 = vpop.xlane.xlu0 %251  ;;  %v1034_v30 = vpop.xlane.xlu1 %254 }
  0xae   : > { %761 = vpow2.f32 %v272_v27  ;;  %v266_v31 = vsub.f32 %v1000_v8, %v1032_v29  ;;  %v267_v32 = vsub.f32 %v1002_v9, %v1034_v30 }
  0xaf   : > { %763 = vpow2.f32 %v276_v28 }
  0xb0   : > { %v278_v33 = vmul.f32 1.442695, %v266_v31  ;;  %v280_v34 = vmul.f32 1.442695, %v267_v32 }
  0xb1   : > { %v1040_v35 = vpop.xlane.xlu0 %257  ;;  %v1042_v36 = vpop.xlane.xlu1 %260 }
  0xb2   : > { %765 = vpow2.f32 %v278_v33  ;;  %v268_v37 = vsub.f32 %v1008_v12, %v1040_v35  ;;  %v269_v38 = vsub.f32 %v1010_v13, %v1042_v36 }
  0xb3   : > { %767 = vpow2.f32 %v280_v34 }
  0xb4   : > { %v282_v39 = vmul.f32 1.442695, %v268_v37  ;;  %v284_v40 = vmul.f32 1.442695, %v269_v38 }
  0xb6   : > { %769 = vpow2.f32 %v282_v39 }
  0xb7   : > { %v758_v41 = vpop.eup %757  ;;  %771 = vpow2.f32 %v284_v40 }
  0xb8   : > { %v760_v42 = vpop.eup %759  ;;  %v286_v43 = vsel %vm237_vm0, %v758_v41, 0.0 }
  0xb9   : > { %287 = vadd.xlane.f32.xlu0 %v286_v43  ;;  %v292_v44 = vsel %vm237_vm0, %v760_v42, 0.0 }
  0xbb   : > { %v762_v45 = vpop.eup %761 }
  0xbc   : > { %v764_v46 = vpop.eup %763  ;;  %v289_v47 = vsel %vm237_vm0, %v762_v45, 0.0 }
  0xbd   : > { %293 = vadd.xlane.f32.xlu0 %v292_v44  ;;  %290 = vadd.xlane.f32.xlu1 %v289_v47  ;;  %v295_v48 = vsel %vm237_vm0, %v764_v46, 0.0 }
  0xbf   : > { %v766_v49 = vpop.eup %765 }
  0xc0   : > { %v768_v50 = vpop.eup %767  ;;  %v298_v51 = vsel %vm237_vm0, %v766_v49, 0.0 }
  0xc1   : > { %296 = vadd.xlane.f32.xlu1 %v295_v48  ;;  %299 = vadd.xlane.f32.xlu0 %v298_v51  ;;  %v301_v52 = vsel %vm237_vm0, %v768_v50, 0.0 }
  0xc3   : > { %v770_v53 = vpop.eup %769 }
  0xc4   : > { %v772_v54 = vpop.eup %771  ;;  %v304_v55 = vsel %vm237_vm0, %v770_v53, 0.0 }
  0xc5   : > { %302 = vadd.xlane.f32.xlu1 %v301_v52  ;;  %305 = vadd.xlane.f32.xlu0 %v304_v55  ;;  %v307_v56 = vsel %vm237_vm0, %v772_v54, 0.0 }
  0xc9   : > { %308 = vadd.xlane.f32.xlu1 %v307_v56 }
  0xdb   : > { %346 = vperm.xlu0 %755, %v342_v57  }
 0x142   : > { %v288_v58 = vpop.xlane.xlu0 %287 }
 0x146   : > { %v291_v59 = vpop.xlane.xlu1 %290  ;;  %v294_v60 = vpop.xlane.xlu0 %293 }
 0x147   : > { %773 = vlog2.f32 %v291_v59 }
 0x148   : > { %775 = vlog2.f32 %v294_v60 }
 0x14a   : > { %v300_v61 = vpop.xlane.xlu0 %299  ;;  %v297_v39 = vpop.xlane.xlu1 %296 }
 0x14b   : > { %777 = vlog2.f32 %v300_v61 }
 0x14e   : > { %v306_v62 = vpop.xlane.xlu0 %305  ;;  %v303_v43 = vpop.xlane.xlu1 %302 }
 0x14f   : > { %779 = vlog2.f32 %v306_v62 }
 0x150   : > { %781 = vlog2.f32 %v288_v58 }
 0x151   : > { %783 = vlog2.f32 %v297_v39 }
 0x152   : > { %785 = vlog2.f32 %v303_v43  ;;  %v309_v46 = vpop.xlane.xlu1 %308 }
 0x153   : > { %787 = vlog2.f32 %v309_v46 }
 0x154   : > { %v774_v4 = vpop.eup %773 }
 0x155   : > { %v776_v6 = vpop.eup %775  ;;  %v313_v7 = vmul.f32 0.6931472, %v774_v4  ;;  %v426_v4 = vshrl.u32 %v343_v63, 7 }
 0x156   : > { %v315_v10 = vmul.f32 0.6931472, %v776_v6  ;;  %v347_v11 = vpop.permute.xlu0 %346 }
 0x157   : > { %vm1064_vm1 = vcmp.eq.s32.totalorder %v1061_v3, %v347_v11  ;;  %v1069_v15 = vadd.f32 %v313_v7, %v1024_v23  ;;  %v1142_v7 = vsub.s32 %v1061_v3, %v426_v4 }
 0x158   : > { %v351_v16 = vsel %vm1064_vm1, %v984_v0, 0.0  ;;  %v778_v19 = vpop.eup %777  ;;  %v1078_v22 = vadd.f32 %v315_v10, %v1018_v18  ;;  %v352_v23 = vsel %vm1064_vm1, %v988_v2, 0.0  ;;  %v353_v18 = vsel %vm1064_vm1, %v986_v1, 0.0 }
 0x159   : > { %v359_v20 = vsel %vm237_vm0, %v351_v16, 0.0  ;;  %v335_v21 = vsub.f32 %v988_v2, %v1069_v15  ;;  %v319_v25 = vmul.f32 0.6931472, %v778_v19  ;;  %v362_v27 = vsel %vm237_vm0, %v352_v23, 0.0 }
 0x15a   : > { %360 = vadd.xlane.f32.xlu1 %v359_v20  ;;  %v336_v28 = vsub.f32 %v986_v1, %v1078_v22  ;;  %v365_v33 = vsel %vm237_vm0, %v353_v18, 0.0  ;;  %v355_v38 = vsel %vm1064_vm1, %v1000_v8, 0.0  ;;  %v356_v40 = vsel %vm1064_vm1, %v1002_v9, 0.0 }
 0x15b   : > { %405 = vperm.xlu0 %755, %v335_v21   ;;  %v1087_v31 = vadd.f32 %v319_v25, %v1032_v29  ;;  %v354_v29 = vsel %vm1064_vm1, %v994_v5, 0.0  ;;  %v374_v41 = vsel %vm237_vm0, %v356_v40, 0.0  ;;  %v357_v42 = vsel %vm1064_vm1, %v1008_v12, 0.0 }
 0x15c   : > { %v780_v26 = vpop.eup %779  ;;  %v368_v37 = vsel %vm237_vm0, %v354_v29, 0.0  ;;  %v358_v44 = vsel %vm1064_vm1, %v1010_v13, 0.0 }
 0x15d   : > { %v323_v32 = vmul.f32 0.6931472, %v780_v26  ;;  %v338_v2 = vsub.f32 %v1000_v8, %v1087_v31  ;;  %v377_v8 = vsel %vm237_vm0, %v357_v42, 0.0  ;;  %v380_v45 = vsel %vm237_vm0, %v358_v44, 0.0  ;;  %v782_v47 = vpop.eup %781 }
 0x15e   : > { %363 = vadd.xlane.f32.xlu1 %v362_v27  ;;  %v311_v48 = vmul.f32 0.6931472, %v782_v47  ;;  %v784_v49 = vpop.eup %783 }
 0x15f   : > { %408 = vperm.xlu0 %755, %v336_v28   ;;  %v1096_v34 = vadd.f32 %v323_v32, %v1040_v35  ;;  %v371_v35 = vsel %vm237_vm0, %v355_v38, 0.0  ;;  %v786_v51 = vpop.eup %785 }
 0x160   : > { %v326_v50 = vadd.f32 %v311_v48, %v1016_v17  ;;  %v321_v52 = vmul.f32 0.6931472, %v786_v51  ;;  %v788_v55 = vpop.eup %787  ;;  %v898_v17 = vmov 0.0  }
 0x161   : > { %v340_v1 = vsub.f32 %v1008_v12, %v1096_v34  ;;  %v317_v12 = vmul.f32 0.6931472, %v784_v49  ;;  %v325_v56 = vmul.f32 0.6931472, %v788_v55  ;;  %392 = vst [vmem:[%s1129_s10] sm:$0xff] %v898_v17  ;;  %391 = vst [vmem:[%s1135_s11] sm:$0xff] %v898_v17 }
 0x162   : > { %366 = vadd.xlane.f32.xlu1 %v365_v33  ;;  %v334_v53 = vsub.f32 %v984_v0, %v326_v50  ;;  %v331_v58 = vadd.f32 %v321_v52, %v1034_v30 }
 0x163   : > { %414 = vperm.xlu0 %755, %v338_v2   ;;  %v329_v54 = vadd.f32 %v317_v12, %v1026_v24  ;;  %v333_v24 = vadd.f32 %v325_v56, %v1042_v36 }
 0x164   : > { %v339_v0 = vsub.f32 %v1002_v9, %v331_v58 }
 0x165   : > { %v337_v57 = vsub.f32 %v994_v5, %v329_v54  ;;  %v341_v59 = vsub.f32 %v1010_v13, %v333_v24 }
 0x166   : > { %369 = vadd.xlane.f32.xlu1 %v368_v37 }
 0x167   : > { %420 = vperm.xlu0 %755, %v340_v1  }
 0x16a   : > { %372 = vadd.xlane.f32.xlu1 %v371_v35 }
 0x16e   : > { %375 = vadd.xlane.f32.xlu1 %v374_v41 }
 0x172   : > { %378 = vadd.xlane.f32.xlu1 %v377_v8 }
 0x176   : > { %381 = vadd.xlane.f32.xlu1 %v380_v45 }
 0x187   : > { %402 = vperm.xlu1 %756, %v334_v53  }
 0x18b   : > { %411 = vperm.xlu1 %756, %v337_v57  }
 0x18f   : > { %417 = vperm.xlu1 %756, %v339_v0  }
 0x193   : > { %423 = vperm.xlu1 %756, %v341_v59  }
 0x1d6   : > { %v406_v14 = vpop.permute.xlu0 %405 }
 0x1d7   : > { %v432_v1 = vrot.slane %v406_v14, %v1142_v7 }
 0x1e3   : > { %v361_v5 = vpop.xlane.xlu1 %360 }
 0x1e4   : > { %v383_v13 = vsub.f32 %v361_v5, %v326_v50 }
 0x1e7   : > { %v364_v30 = vpop.xlane.xlu1 %363 }
 0x1e8   : > { %v384_v6 = vsub.f32 %v364_v30, %v1069_v15  ;;  %v485_v15 = vrot.slane %v383_v13, %v1142_v7 }
 0x1ea   : > { %v489_v16 = vrot.slane %v384_v6, %v1142_v7 }
 0x1eb   : > { %v367_v60 = vpop.xlane.xlu1 %366 }
 0x1ec   : > { %v385_v9 = vsub.f32 %v367_v60, %v1078_v22  ;;  %v514_v25 = vsel %vm457_vm2, %v489_v16, %v485_v15 }
 0x1ee   : > { %v493_v20 = vrot.slane %v385_v9, %v1142_v7 }
 0x1ef   : > { %v370_v61 = vpop.xlane.xlu1 %369 }
 0x1f0   : > { %v386_v10 = vsub.f32 %v370_v61, %v329_v54  ;;  %v515_v26 = vsel %vm459_vm3, %v493_v20, %v514_v25 }
 0x1f2   : > { %v497_v21 = vrot.slane %v386_v10, %v1142_v7 }
 0x1f3   : > { %v373_v62 = vpop.xlane.xlu1 %372 }
 0x1f4   : > { %v387_v11 = vsub.f32 %v373_v62, %v1087_v31  ;;  %v409_v31 = vpop.permute.xlu0 %408  ;;  %v516_v32 = vsel %vm461_vm4, %v497_v21, %v515_v26 }
 0x1f6   : > { %v501_v22 = vrot.slane %v387_v11, %v1142_v7 }
 0x1f7   : > { %v376_v36 = vpop.xlane.xlu1 %375 }
 0x1f8   : > { %v388_v19 = vsub.f32 %v376_v36, %v331_v58  ;;  %v517_v33 = vsel %vm463_vm5, %v501_v22, %v516_v32  ;;  %v415_v39 = vpop.permute.xlu0 %414 }
 0x1fa   : > { %v505_v23 = vrot.slane %v388_v19, %v1142_v7 }
 0x1fb   : > { %v379_v63 = vpop.xlane.xlu1 %378 }
 0x1fc   : > { %v389_v3 = vsub.f32 %v379_v63, %v1096_v34  ;;  %v518_v2 = vsel %vm465_vm6, %v505_v23, %v517_v33 }
 0x1fe   : > { %v509_v27 = vrot.slane %v389_v3, %v1142_v7 }
 0x1ff   : > { %v382_v28 = vpop.xlane.xlu1 %381 }
 0x200   : > { %v390_v18 = vsub.f32 %v382_v28, %v333_v24  ;;  %v519_v29 = vsel %vm467_vm7, %v509_v27, %v518_v2 }
 0x202   : > { %v513_v34 = vrot.slane %v390_v18, %v1142_v7 }
 0x203   : > { %v403_v37 = vpop.permute.xlu1 %402 }
 0x204   : > { %v520_v38 = vsel %vm469_vm8, %v513_v34, %v519_v29  ;;  %v428_v35 = vrot.slane %v403_v37, %v1142_v7 }
 0x205   : > { %522 = vst.msk [vmem:[%s1129_s10] sm:$0xff] %vm472_vm9, %v520_v38 }
 0x206   : > { %v458_v40 = vsel %vm457_vm2, %v432_v1, %v428_v35 }
 0x207   : > { %802 = shalt.err (!%p799_p5)
}
 0x208   : > { %s803_s5 = scalar_lea.hbm %s1167_s26, 128  ;;  %s807_s9 = scalar_lea.hbm %s1262_s3, 256 }
 0x209   : > { %p804_p6 = scmp.ne.s32.totalorder %s1167_s26, %s803_s5  ;;  %p808_p10 = scmp.lt.s32.totalorder %s1167_s26, %s1262_s3 }
 0x20a   : > { %p809_p11 = scmp.lt.s32.totalorder %s807_s9, %s803_s5 }
 0x20b   : > { %p805_p7 = pnand %p804_p6, %p961_p4 }
 0x20c   : > { %p810_p12 = por %p809_p11, %p808_p10 }
 0x20d   : > { %p806_p9 = pneg %p805_p7 }
 0x20f   : > { %p811_p13 = pnand %p810_p12, %p806_p9 }
 0x211   : > { %814 = shalt.err (!%p811_p13)
}
 0x212   : > { %694 = dma.vmem_to_hbm [thread:$0]  (%p961_p4), %s1169_s19, 128, %s1167_s26, %s529_s27   ;;  %v436_v41 = vrot.slane %v409_v31, %v1142_v7  ;;  %v412_v42 = vpop.permute.xlu1 %411  ;;  %v444_v45 = vrot.slane %v415_v39, %v1142_v7  ;;  %v421_v47 = vpop.permute.xlu0 %420 }
 0x213   : > { %v440_v43 = vrot.slane %v412_v42, %v1142_v7  ;;  %s543_s19 = sshll.u32 %s1135_s11, 4  ;;  %v452_v50 = vrot.slane %v421_v47, %v1142_v7  ;;  %s1215_s27 = scalar_lea.hbm %s1261_s2, %s688_s18  ;;  %s544_s19 = int_to_ptr.vmem [resolvable:$true] %s543_s19 }
 0x214   : > { %v460_v8 = vsel %vm459_vm3, %v436_v41, %v458_v40  ;;  %s524_s28 = scalar_lea.sflag [#allocation3], %s1124_s8  ;;  %s815_s29 = scalar_lea.vmem %s544_s19, 128 }
 0x215   : > { %v462_v44 = vsel %vm461_vm4, %v440_v43, %v460_v8  ;;  %p816_p0 = scmp.ne.s32.totalorder %s544_s19, %s815_s29  ;;  %s900_s30 = smov [#allocation2]  }
 0x216   : > { %v418_v46 = vpop.permute.xlu1 %417  ;;  %v464_v49 = vsel %vm463_vm5, %v444_v45, %v462_v44  ;;  %s819_s4 = sshll.u32 %s900_s30, 4  ;;  %s820_s4 = int_to_ptr.vmem [resolvable:$false] %s819_s4 }
 0x217   : > { %v448_v48 = vrot.slane %v418_v46, %v1142_v7  ;;  %p817_p1 = pnand %p816_p0, %p961_p4  ;;  %s821_s15 = scalar_lea.vmem %s820_s4, 256 }
 0x218   : > { %p822_p3 = scmp.lt.s32.totalorder %s544_s19, %s820_s4  ;;  %p823_p5 = scmp.lt.s32.totalorder %s821_s15, %s815_s29 }
 0x219   : > { %v466_v12 = vsel %vm465_vm6, %v448_v48, %v464_v49  ;;  %p818_p2 = pneg %p817_p1 }
 0x21a   : > { %v424_v51 = vpop.permute.xlu1 %423  ;;  %v468_v53 = vsel %vm467_vm7, %v452_v50, %v466_v12  ;;  %p824_p6 = por %p823_p5, %p822_p3 }
 0x21b   : > { %v456_v52 = vrot.slane %v424_v51, %v1142_v7 }
 0x21c   : > { %p825_p7 = pnand %p824_p6, %p818_p2 }
 0x21d   : > { %v470_v54 = vsel %vm469_vm8, %v456_v52, %v468_v53 }
 0x21e   : > { %473 = vst.msk [vmem:[%s1135_s11] sm:$0xff] %vm472_vm9, %v470_v54 }
 0x21f   : > { %828 = shalt.err (!%p825_p7)
}
 0x220   : > { %s829_s11 = scalar_lea.hbm %s1215_s27, 128  ;;  %s833_s5 = scalar_lea.hbm %s1261_s2, 256 }
 0x221   : > { %p830_p9 = scmp.ne.s32.totalorder %s1215_s27, %s829_s11  ;;  %p834_p12 = scmp.lt.s32.totalorder %s1215_s27, %s1261_s2 }
 0x222   : > { %p835_p13 = scmp.lt.s32.totalorder %s833_s5, %s829_s11 }
 0x223   : > { %p831_p10 = pnand %p830_p9, %p961_p4 }
 0x224   : > { %p836_p0 = por %p835_p13, %p834_p12 }
 0x225   : > { %p832_p11 = pneg %p831_p10 }
 0x227   : > { %p837_p1 = pnand %p836_p0, %p832_p11 }
 0x229   : > { %840 = shalt.err (!%p837_p1)
}
 0x22a   : > { %693 = dma.vmem_to_hbm [thread:$0]  (%p961_p4), %s544_s19, 128, %s1215_s27, %s524_s28  }
 0x22b PF: > { %p704_p2 = scmp.ge.s32.totalorder %s895_s17, 2  ;;  %s569_s9 = sand.u32 1, %s875_s12  }
 0x22c   : > { %s570_s10 = scalar_lea.sflag [#allocation3], %s569_s9 }
 0x22d   : > { %p698_p3 = pnand %p704_p2, %p968_p8 }
 0x22f   : > { %p699_p5 = pneg %p698_p3 }
 0x231   : > { %866 = dma.done.wait (%p699_p5), %s570_s10, 128  }
 0x232   : > { %868 = vsyncadd (%p699_p5), %s570_s10, 4294967168  ;;  %s579_s21 = scalar_lea.sflag [#allocation5], %s569_s9 }
 0x233   : > { %870 = dma.done.wait (%p699_p5), %s579_s21, 128  }
 0x234   : > { %872 = vsyncadd (%p699_p5), %s579_s21, 4294967168  ;;  %s20_s17 = sadd.s32 1, %s895_s17   ;;  %s1267_s12 = smov %s879_s13 }
 0x235   : > { %p17_p6 = scmp.ge.s32.totalorder %s20_s17, 4   ;;  %s1268_s13 = smov %s883_s14 }
 0x236   : > { %s1269_s14 = smov %s974_s25  ;;  %s1270_s15 = smov %s891_s16 }
 0x237   : > { %s1271_s16 = smov %s1273_s20  ;;  %19 = sbr.rel (!%p17_p6) target bundleno = 6 (0x6), region = 83 }
 0x23c   :  { %584 = vsyncpa [#allocation3], 1 }
 0x23d   :  { %586 = vsyncpa [#allocation3 + $0x1], 1 }
 0x23e   :  { %587 = vsyncpa [#allocation5], 1 }
 0x23f   :  { %589 = vsyncpa [#allocation5 + $0x1], 1 }

</bundles_post_ra>
